<compile_context>
chip_gen: v7x
topology: tpu7x:2x2x1
jax: 0.10.0
libtpu: 0.0.40
codegen_flags: <defaults>
</compile_context>

<pallas_src>
import functools

import jax
import jax.numpy as jnp
from jax import lax
from jax.experimental import pallas as pl
from jax.experimental.pallas import tpu as pltpu

_LANES = 128          # lane width of a vreg; last dim of every block
_LANE_SHIFT = 7       # log2(_LANES)
_ROTATIONS = (13, 15, 26, 6, 17, 29, 16, 24)
_THREEFRY_PARITY = 0x1BD11BDA


def _rotl32(x, r):
    """Rotate-left of uint32 by a static amount r (pure shift/or, no multiply)."""
    return (x << r) | (x >> (32 - r))


def _threefry2x32(key0, key1, ctr0, ctr1):
    """Standard 20-round Threefry-2x32 block cipher, elementwise on uint32."""
    ks = (key0, key1, key0 ^ key1 ^ jnp.uint32(_THREEFRY_PARITY))
    x0 = ctr0 + ks[0]
    x1 = ctr1 + ks[1]
    for block in range(5):
        for r in _ROTATIONS[(block % 2) * 4:(block % 2) * 4 + 4]:
            x0 = x0 + x1
            x1 = _rotl32(x1, r)
            x1 = x1 ^ x0
        x0 = x0 + ks[(block + 1) % 3]
        x1 = x1 + ks[(block + 2) % 3] + jnp.uint32(block + 1)
    return x0, x1


def _disturb_label_kernel(seed_ref, y_ref, out_ref, *, C, p_c, p_i, inv_p_i):
    rows, lanes = y_ref.shape
    assert lanes == _LANES
    blk = pl.program_id(0)

    # Global flat element index -> PRNG counter (independent stream per block,
    # so the "same seed every grid step" correlation issue cannot occur).
    row_ids = lax.broadcasted_iota(jnp.uint32, (rows, lanes), 0)
    lane_ids = lax.broadcasted_iota(jnp.uint32, (rows, lanes), 1)
    base_row = jnp.uint32(blk) * jnp.uint32(rows)                 # scalar
    ctr = ((base_row + row_ids) << _LANE_SHIFT) | lane_ids        # global_row*128 + lane

    seed = seed_ref[0].astype(jnp.uint32)
    bits, _ = _threefry2x32(seed, jnp.uint32(0x9E3779B9), ctr, jnp.uint32(0))

    # uint32 bits -> uniform float32 in [0, 1): stuff 23 random bits into the
    # f32 mantissa ([1, 2) trick), then subtract 1.  Pure bit ops + one VPU sub.
    mant = (bits >> 9) | jnp.uint32(0x3F800000)
    u = lax.bitcast_convert_type(mant, jnp.float32) - jnp.float32(1.0)

    # Closed-form inverse CDF of the disturbed-label categorical:
    #   CDF(k) = (k+1)*p_i                 for k <  label
    #   CDF(k) = (k+1)*p_i + (p_c - p_i)   for k >= label
    label = y_ref[...]                          # (rows, 128) int32
    label_f = label.astype(jnp.float32)
    lo = label_f * jnp.float32(p_i)             # CDF mass strictly below true class
    hi = lo + jnp.float32(p_c)                  # ... through the true class

    k_low = (u * jnp.float32(inv_p_i)).astype(jnp.int32)
    k_high = ((u - jnp.float32(p_c - p_i)) * jnp.float32(inv_p_i)).astype(jnp.int32)

    sampled = jnp.where(u < lo, k_low, jnp.where(u < hi, label, k_high))
    out_ref[...] = jnp.clip(sampled, 0, C - 1)   # guard float boundary rounding


def disturb_label(y, seed, *, alpha, C, block_rows=512):
    """Pallas-backed DisturbLabel forward.

    y: integer labels (typically 1-D, shape (N,)).  Returns int32 labels with
    the same shape.  (PyTorch returns int64; JAX x64 is off by default.)
    """
    p_c = 1.0 - (C - 1) / C * (alpha / 100.0)
    p_i = (1.0 / C) * (alpha / 100.0)
    inv_p_i = 1.0 / p_i if p_i > 0.0 else 0.0

    orig_shape = y.shape
    y_flat = jnp.reshape(y, (-1,)).astype(jnp.int32)
    n = int(y_flat.shape[0])

    # Lane-dense layout: pad to full (rows, 128) tiles, rows % 8 == 0.
    rows_needed = max(1, -(-n // _LANES))
    if rows_needed >= block_rows:
        tile_rows = block_rows
    else:
        tile_rows = ((rows_needed + 7) // 8) * 8
    num_blocks = -(-rows_needed // tile_rows)
    rows_padded = num_blocks * tile_rows
    n_padded = rows_padded * _LANES

    y_pad = jnp.zeros((n_padded,), jnp.int32).at[:n].set(y_flat)
    y2d = y_pad.reshape(rows_padded, _LANES)
    seed_arr = jnp.asarray([seed], dtype=jnp.int32)

    kernel = functools.partial(
        _disturb_label_kernel,
        C=int(C), p_c=float(p_c), p_i=float(p_i), inv_p_i=float(inv_p_i),
    )

    out2d = pl.pallas_call(
        kernel,
        out_shape=jax.ShapeDtypeStruct((rows_padded, _LANES), jnp.int32),
        grid_spec=pltpu.PrefetchScalarGridSpec(
            num_scalar_prefetch=1,                       # seed -> SMEM
            grid=(num_blocks,),
            in_specs=[pl.BlockSpec((tile_rows, _LANES), lambda i, seed: (i, 0))],
            out_specs=pl.BlockSpec((tile_rows, _LANES), lambda i, seed: (i, 0)),
        ),
        compiler_params=pltpu.CompilerParams(
            dimension_semantics=("parallel",),           # shard rows across v7x's 2 TCs
        ),
    )(seed_arr, y2d)

    return out2d.reshape(-1)[:n].reshape(orig_shape)


if __name__ == "__main__":
    alpha = 20.0
    C = 10
    N = 8

    key = jax.random.PRNGKey(0)
    y = jax.random.randint(key, (N,), 0, C, dtype=jnp.int32)

    y_dist = jax.block_until_ready(disturb_label(y, seed=1234, alpha=alpha, C=C))
    assert y_dist.shape == (N,)
    assert y_dist.dtype == jnp.int32
    assert bool(jnp.all((y_dist >= 0) & (y_dist < C)))

    # alpha = 0  =>  p_c = 1: labels must pass through unchanged.
    y_same = jax.block_until_ready(disturb_label(y, seed=7, alpha=0.0, C=C))
    assert bool(jnp.all(y_same == y))

    # Moderate statistical sanity check: P(label kept) = p_c = 0.82 for alpha=20, C=10.
    y_big = jax.random.randint(jax.random.PRNGKey(1), (2048,), 0, C, dtype=jnp.int32)
    y_big_d = jax.block_until_ready(disturb_label(y_big, seed=42, alpha=alpha, C=C))
    kept = float(jnp.mean((y_big_d == y_big).astype(jnp.float32)))
    assert 0.72 < kept < 0.92, kept
    assert bool(jnp.all((y_big_d >= 0) & (y_big_d < C)))

    print("KERNEL_OK")
</pallas_src>

<mosaic_0001>
module attributes {stable_mosaic.version = 11 : i64} {
  func.func @_disturb_label_kernel(%arg0: i32, %arg1: memref<1xi32, #tpu.memory_space<smem>>, %arg2: memref<8x128xi32, #tpu.memory_space<vmem>>, %arg3: memref<8x128xi32, #tpu.memory_space<vmem>>) attributes {dimension_semantics = [#tpu.dimension_semantics<parallel>], iteration_bounds = array<i64: 1>, scalar_prefetch = 1 : i64, scratch_operands = 0 : i64, tpu.core_type = #tpu.core_type<tc>, window_params = [{transform_indices = @transform_0, window_bounds = array<i64: 8, 128>}, {transform_indices = @transform_1, window_bounds = array<i64: 8, 128>}]} {
    %0 = tpu.iota {dimensions = array<i32: 0>} : vector<8x128xi32>
    %1 = tpu.iota {dimensions = array<i32: 1>} : vector<8x128xi32>
    %c8_i32 = arith.constant 8 : i32
    %2 = arith.muli %arg0, %c8_i32 : i32
    %3 = vector.broadcast %2 : i32 to vector<8x128xi32>
    %4 = arith.addi %3, %0 : vector<8x128xi32>
    %c7_i32 = arith.constant 7 : i32
    %5 = vector.broadcast %c7_i32 : i32 to vector<8x128xi32>
    %6 = arith.shli %4, %5 : vector<8x128xi32>
    %7 = arith.ori %6, %1 : vector<8x128xi32>
    %c0 = arith.constant 0 : index
    %8 = memref.load %arg1[%c0] : memref<1xi32, #tpu.memory_space<smem>>
    %c-1640531527_i32 = arith.constant -1640531527 : i32
    %9 = arith.xori %8, %c-1640531527_i32 : i32
    %c466688986_i32 = arith.constant 466688986 : i32
    %10 = arith.xori %9, %c466688986_i32 : i32
    %11 = vector.broadcast %8 : i32 to vector<8x128xi32>
    %12 = arith.addi %7, %11 : vector<8x128xi32>
    %c0_i32 = arith.constant 0 : i32
    %c-1640531527_i32_0 = arith.constant -1640531527 : i32
    %13 = arith.addi %c0_i32, %c-1640531527_i32_0 : i32
    %14 = vector.broadcast %13 : i32 to vector<8x128xi32>
    %15 = arith.addi %12, %14 : vector<8x128xi32>
    %c13_i32 = arith.constant 13 : i32
    %16 = arith.shli %13, %c13_i32 : i32
    %c19_i32 = arith.constant 19 : i32
    %17 = arith.shrui %13, %c19_i32 : i32
    %18 = arith.ori %16, %17 : i32
    %19 = vector.broadcast %18 : i32 to vector<8x128xi32>
    %20 = arith.xori %19, %15 : vector<8x128xi32>
    %21 = arith.addi %15, %20 : vector<8x128xi32>
    %c15_i32 = arith.constant 15 : i32
    %22 = vector.broadcast %c15_i32 : i32 to vector<8x128xi32>
    %23 = arith.shli %20, %22 : vector<8x128xi32>
    %c17_i32 = arith.constant 17 : i32
    %24 = vector.broadcast %c17_i32 : i32 to vector<8x128xi32>
    %25 = arith.shrui %20, %24 : vector<8x128xi32>
    %26 = arith.ori %23, %25 : vector<8x128xi32>
    %27 = arith.xori %26, %21 : vector<8x128xi32>
    %28 = arith.addi %21, %27 : vector<8x128xi32>
    %c26_i32 = arith.constant 26 : i32
    %29 = vector.broadcast %c26_i32 : i32 to vector<8x128xi32>
    %30 = arith.shli %27, %29 : vector<8x128xi32>
    %c6_i32 = arith.constant 6 : i32
    %31 = vector.broadcast %c6_i32 : i32 to vector<8x128xi32>
    %32 = arith.shrui %27, %31 : vector<8x128xi32>
    %33 = arith.ori %30, %32 : vector<8x128xi32>
    %34 = arith.xori %33, %28 : vector<8x128xi32>
    %35 = arith.addi %28, %34 : vector<8x128xi32>
    %c6_i32_1 = arith.constant 6 : i32
    %36 = vector.broadcast %c6_i32_1 : i32 to vector<8x128xi32>
    %37 = arith.shli %34, %36 : vector<8x128xi32>
    %c26_i32_2 = arith.constant 26 : i32
    %38 = vector.broadcast %c26_i32_2 : i32 to vector<8x128xi32>
    %39 = arith.shrui %34, %38 : vector<8x128xi32>
    %40 = arith.ori %37, %39 : vector<8x128xi32>
    %41 = arith.xori %40, %35 : vector<8x128xi32>
    %c-1640531527_i32_3 = arith.constant -1640531527 : i32
    %42 = vector.broadcast %c-1640531527_i32_3 : i32 to vector<8x128xi32>
    %43 = arith.addi %35, %42 : vector<8x128xi32>
    %44 = vector.broadcast %10 : i32 to vector<8x128xi32>
    %45 = arith.addi %41, %44 : vector<8x128xi32>
    %c1_i32 = arith.constant 1 : i32
    %46 = vector.broadcast %c1_i32 : i32 to vector<8x128xi32>
    %47 = arith.addi %45, %46 : vector<8x128xi32>
    %48 = arith.addi %43, %47 : vector<8x128xi32>
    %c17_i32_4 = arith.constant 17 : i32
    %49 = vector.broadcast %c17_i32_4 : i32 to vector<8x128xi32>
    %50 = arith.shli %47, %49 : vector<8x128xi32>
    %c15_i32_5 = arith.constant 15 : i32
    %51 = vector.broadcast %c15_i32_5 : i32 to vector<8x128xi32>
    %52 = arith.shrui %47, %51 : vector<8x128xi32>
    %53 = arith.ori %50, %52 : vector<8x128xi32>
    %54 = arith.xori %53, %48 : vector<8x128xi32>
    %55 = arith.addi %48, %54 : vector<8x128xi32>
    %c29_i32 = arith.constant 29 : i32
    %56 = vector.broadcast %c29_i32 : i32 to vector<8x128xi32>
    %57 = arith.shli %54, %56 : vector<8x128xi32>
    %c3_i32 = arith.constant 3 : i32
    %58 = vector.broadcast %c3_i32 : i32 to vector<8x128xi32>
    %59 = arith.shrui %54, %58 : vector<8x128xi32>
    %60 = arith.ori %57, %59 : vector<8x128xi32>
    %61 = arith.xori %60, %55 : vector<8x128xi32>
    %62 = arith.addi %55, %61 : vector<8x128xi32>
    %c16_i32 = arith.constant 16 : i32
    %63 = vector.broadcast %c16_i32 : i32 to vector<8x128xi32>
    %64 = arith.shli %61, %63 : vector<8x128xi32>
    %c16_i32_6 = arith.constant 16 : i32
    %65 = vector.broadcast %c16_i32_6 : i32 to vector<8x128xi32>
    %66 = arith.shrui %61, %65 : vector<8x128xi32>
    %67 = arith.ori %64, %66 : vector<8x128xi32>
    %68 = arith.xori %67, %62 : vector<8x128xi32>
    %69 = arith.addi %62, %68 : vector<8x128xi32>
    %c24_i32 = arith.constant 24 : i32
    %70 = vector.broadcast %c24_i32 : i32 to vector<8x128xi32>
    %71 = arith.shli %68, %70 : vector<8x128xi32>
    %c8_i32_7 = arith.constant 8 : i32
    %72 = vector.broadcast %c8_i32_7 : i32 to vector<8x128xi32>
    %73 = arith.shrui %68, %72 : vector<8x128xi32>
    %74 = arith.ori %71, %73 : vector<8x128xi32>
    %75 = arith.xori %74, %69 : vector<8x128xi32>
    %76 = vector.broadcast %10 : i32 to vector<8x128xi32>
    %77 = arith.addi %69, %76 : vector<8x128xi32>
    %78 = vector.broadcast %8 : i32 to vector<8x128xi32>
    %79 = arith.addi %75, %78 : vector<8x128xi32>
    %c2_i32 = arith.constant 2 : i32
    %80 = vector.broadcast %c2_i32 : i32 to vector<8x128xi32>
    %81 = arith.addi %79, %80 : vector<8x128xi32>
    %82 = arith.addi %77, %81 : vector<8x128xi32>
    %c13_i32_8 = arith.constant 13 : i32
    %83 = vector.broadcast %c13_i32_8 : i32 to vector<8x128xi32>
    %84 = arith.shli %81, %83 : vector<8x128xi32>
    %c19_i32_9 = arith.constant 19 : i32
    %85 = vector.broadcast %c19_i32_9 : i32 to vector<8x128xi32>
    %86 = arith.shrui %81, %85 : vector<8x128xi32>
    %87 = arith.ori %84, %86 : vector<8x128xi32>
    %88 = arith.xori %87, %82 : vector<8x128xi32>
    %89 = arith.addi %82, %88 : vector<8x128xi32>
    %c15_i32_10 = arith.constant 15 : i32
    %90 = vector.broadcast %c15_i32_10 : i32 to vector<8x128xi32>
    %91 = arith.shli %88, %90 : vector<8x128xi32>
    %c17_i32_11 = arith.constant 17 : i32
    %92 = vector.broadcast %c17_i32_11 : i32 to vector<8x128xi32>
    %93 = arith.shrui %88, %92 : vector<8x128xi32>
    %94 = arith.ori %91, %93 : vector<8x128xi32>
    %95 = arith.xori %94, %89 : vector<8x128xi32>
    %96 = arith.addi %89, %95 : vector<8x128xi32>
    %c26_i32_12 = arith.constant 26 : i32
    %97 = vector.broadcast %c26_i32_12 : i32 to vector<8x128xi32>
    %98 = arith.shli %95, %97 : vector<8x128xi32>
    %c6_i32_13 = arith.constant 6 : i32
    %99 = vector.broadcast %c6_i32_13 : i32 to vector<8x128xi32>
    %100 = arith.shrui %95, %99 : vector<8x128xi32>
    %101 = arith.ori %98, %100 : vector<8x128xi32>
    %102 = arith.xori %101, %96 : vector<8x128xi32>
    %103 = arith.addi %96, %102 : vector<8x128xi32>
    %c6_i32_14 = arith.constant 6 : i32
    %104 = vector.broadcast %c6_i32_14 : i32 to vector<8x128xi32>
    %105 = arith.shli %102, %104 : vector<8x128xi32>
    %c26_i32_15 = arith.constant 26 : i32
    %106 = vector.broadcast %c26_i32_15 : i32 to vector<8x128xi32>
    %107 = arith.shrui %102, %106 : vector<8x128xi32>
    %108 = arith.ori %105, %107 : vector<8x128xi32>
    %109 = arith.xori %108, %103 : vector<8x128xi32>
    %110 = vector.broadcast %8 : i32 to vector<8x128xi32>
    %111 = arith.addi %103, %110 : vector<8x128xi32>
    %c-1640531527_i32_16 = arith.constant -1640531527 : i32
    %112 = vector.broadcast %c-1640531527_i32_16 : i32 to vector<8x128xi32>
    %113 = arith.addi %109, %112 : vector<8x128xi32>
    %c3_i32_17 = arith.constant 3 : i32
    %114 = vector.broadcast %c3_i32_17 : i32 to vector<8x128xi32>
    %115 = arith.addi %113, %114 : vector<8x128xi32>
    %116 = arith.addi %111, %115 : vector<8x128xi32>
    %c17_i32_18 = arith.constant 17 : i32
    %117 = vector.broadcast %c17_i32_18 : i32 to vector<8x128xi32>
    %118 = arith.shli %115, %117 : vector<8x128xi32>
    %c15_i32_19 = arith.constant 15 : i32
    %119 = vector.broadcast %c15_i32_19 : i32 to vector<8x128xi32>
    %120 = arith.shrui %115, %119 : vector<8x128xi32>
    %121 = arith.ori %118, %120 : vector<8x128xi32>
    %122 = arith.xori %121, %116 : vector<8x128xi32>
    %123 = arith.addi %116, %122 : vector<8x128xi32>
    %c29_i32_20 = arith.constant 29 : i32
    %124 = vector.broadcast %c29_i32_20 : i32 to vector<8x128xi32>
    %125 = arith.shli %122, %124 : vector<8x128xi32>
    %c3_i32_21 = arith.constant 3 : i32
    %126 = vector.broadcast %c3_i32_21 : i32 to vector<8x128xi32>
    %127 = arith.shrui %122, %126 : vector<8x128xi32>
    %128 = arith.ori %125, %127 : vector<8x128xi32>
    %129 = arith.xori %128, %123 : vector<8x128xi32>
    %130 = arith.addi %123, %129 : vector<8x128xi32>
    %c16_i32_22 = arith.constant 16 : i32
    %131 = vector.broadcast %c16_i32_22 : i32 to vector<8x128xi32>
    %132 = arith.shli %129, %131 : vector<8x128xi32>
    %c16_i32_23 = arith.constant 16 : i32
    %133 = vector.broadcast %c16_i32_23 : i32 to vector<8x128xi32>
    %134 = arith.shrui %129, %133 : vector<8x128xi32>
    %135 = arith.ori %132, %134 : vector<8x128xi32>
    %136 = arith.xori %135, %130 : vector<8x128xi32>
    %137 = arith.addi %130, %136 : vector<8x128xi32>
    %c24_i32_24 = arith.constant 24 : i32
    %138 = vector.broadcast %c24_i32_24 : i32 to vector<8x128xi32>
    %139 = arith.shli %136, %138 : vector<8x128xi32>
    %c8_i32_25 = arith.constant 8 : i32
    %140 = vector.broadcast %c8_i32_25 : i32 to vector<8x128xi32>
    %141 = arith.shrui %136, %140 : vector<8x128xi32>
    %142 = arith.ori %139, %141 : vector<8x128xi32>
    %143 = arith.xori %142, %137 : vector<8x128xi32>
    %c-1640531527_i32_26 = arith.constant -1640531527 : i32
    %144 = vector.broadcast %c-1640531527_i32_26 : i32 to vector<8x128xi32>
    %145 = arith.addi %137, %144 : vector<8x128xi32>
    %146 = vector.broadcast %10 : i32 to vector<8x128xi32>
    %147 = arith.addi %143, %146 : vector<8x128xi32>
    %c4_i32 = arith.constant 4 : i32
    %148 = vector.broadcast %c4_i32 : i32 to vector<8x128xi32>
    %149 = arith.addi %147, %148 : vector<8x128xi32>
    %150 = arith.addi %145, %149 : vector<8x128xi32>
    %c13_i32_27 = arith.constant 13 : i32
    %151 = vector.broadcast %c13_i32_27 : i32 to vector<8x128xi32>
    %152 = arith.shli %149, %151 : vector<8x128xi32>
    %c19_i32_28 = arith.constant 19 : i32
    %153 = vector.broadcast %c19_i32_28 : i32 to vector<8x128xi32>
    %154 = arith.shrui %149, %153 : vector<8x128xi32>
    %155 = arith.ori %152, %154 : vector<8x128xi32>
    %156 = arith.xori %155, %150 : vector<8x128xi32>
    %157 = arith.addi %150, %156 : vector<8x128xi32>
    %c15_i32_29 = arith.constant 15 : i32
    %158 = vector.broadcast %c15_i32_29 : i32 to vector<8x128xi32>
    %159 = arith.shli %156, %158 : vector<8x128xi32>
    %c17_i32_30 = arith.constant 17 : i32
    %160 = vector.broadcast %c17_i32_30 : i32 to vector<8x128xi32>
    %161 = arith.shrui %156, %160 : vector<8x128xi32>
    %162 = arith.ori %159, %161 : vector<8x128xi32>
    %163 = arith.xori %162, %157 : vector<8x128xi32>
    %164 = arith.addi %157, %163 : vector<8x128xi32>
    %c26_i32_31 = arith.constant 26 : i32
    %165 = vector.broadcast %c26_i32_31 : i32 to vector<8x128xi32>
    %166 = arith.shli %163, %165 : vector<8x128xi32>
    %c6_i32_32 = arith.constant 6 : i32
    %167 = vector.broadcast %c6_i32_32 : i32 to vector<8x128xi32>
    %168 = arith.shrui %163, %167 : vector<8x128xi32>
    %169 = arith.ori %166, %168 : vector<8x128xi32>
    %170 = arith.xori %169, %164 : vector<8x128xi32>
    %171 = arith.addi %164, %170 : vector<8x128xi32>
    %172 = vector.broadcast %10 : i32 to vector<8x128xi32>
    %173 = arith.addi %171, %172 : vector<8x128xi32>
    %c9_i32 = arith.constant 9 : i32
    %174 = vector.broadcast %c9_i32 : i32 to vector<8x128xi32>
    %175 = arith.shrui %173, %174 : vector<8x128xi32>
    %c1065353216_i32 = arith.constant 1065353216 : i32
    %176 = vector.broadcast %c1065353216_i32 : i32 to vector<8x128xi32>
    %177 = arith.ori %175, %176 : vector<8x128xi32>
    %178 = tpu.bitcast %177 : vector<8x128xi32> -> vector<8x128xf32>
    %cst = arith.constant 1.000000e+00 : f32
    %179 = vector.broadcast %cst : f32 to vector<8x128xf32>
    %180 = arith.subf %178, %179 : vector<8x128xf32>
    %c0_33 = arith.constant 0 : index
    %c0_34 = arith.constant 0 : index
    %181 = vector.load %arg2[%c0_33, %c0_34] : memref<8x128xi32, #tpu.memory_space<vmem>>, vector<8x128xi32>
    %182 = arith.sitofp %181 : vector<8x128xi32> to vector<8x128xf32>
    %cst_35 = arith.constant 2.000000e-02 : f32
    %183 = vector.broadcast %cst_35 : f32 to vector<8x128xf32>
    %184 = arith.mulf %182, %183 : vector<8x128xf32>
    %cst_36 = arith.constant 0.819999992 : f32
    %185 = vector.broadcast %cst_36 : f32 to vector<8x128xf32>
    %186 = arith.addf %184, %185 : vector<8x128xf32>
    %cst_37 = arith.constant 5.000000e+01 : f32
    %187 = vector.broadcast %cst_37 : f32 to vector<8x128xf32>
    %188 = arith.mulf %180, %187 : vector<8x128xf32>
    %189 = arith.fptosi %188 : vector<8x128xf32> to vector<8x128xi32>
    %cst_38 = arith.constant 8.000000e-01 : f32
    %190 = vector.broadcast %cst_38 : f32 to vector<8x128xf32>
    %191 = arith.subf %180, %190 : vector<8x128xf32>
    %cst_39 = arith.constant 5.000000e+01 : f32
    %192 = vector.broadcast %cst_39 : f32 to vector<8x128xf32>
    %193 = arith.mulf %191, %192 : vector<8x128xf32>
    %194 = arith.fptosi %193 : vector<8x128xf32> to vector<8x128xi32>
    %195 = arith.cmpf olt, %180, %184 : vector<8x128xf32>
    %196 = arith.cmpf olt, %180, %186 : vector<8x128xf32>
    %197 = arith.select %196, %181, %194 : vector<8x128xi1>, vector<8x128xi32>
    %198 = arith.select %195, %189, %197 : vector<8x128xi1>, vector<8x128xi32>
    %c0_i32_40 = arith.constant 0 : i32
    %c9_i32_41 = arith.constant 9 : i32
    %199 = vector.broadcast %c0_i32_40 : i32 to vector<8x128xi32>
    %200 = arith.maxsi %199, %198 : vector<8x128xi32>
    %201 = vector.broadcast %c9_i32_41 : i32 to vector<8x128xi32>
    %202 = arith.minsi %201, %200 : vector<8x128xi32>
    %c0_42 = arith.constant 0 : index
    %c0_43 = arith.constant 0 : index
    %203 = vector.load %arg3[%c0_42, %c0_43] : memref<8x128xi32, #tpu.memory_space<vmem>>, vector<8x128xi32>
    tpu.vector_store %arg3[%c0_42, %c0_43], %202 {strides = array<i32>} : memref<8x128xi32, #tpu.memory_space<vmem>>, vector<8x128xi32>,
    return
  }
  func.func @transform_0(%arg0: i32, %arg1: memref<1xi32, #tpu.memory_space<smem>>) -> (i32, i32) {
    %c0_i32 = arith.constant 0 : i32
    %c0_i32_0 = arith.constant 0 : i32
    return %arg0, %c0_i32 : i32, i32
  }
  func.func @transform_1(%arg0: i32, %arg1: memref<1xi32, #tpu.memory_space<smem>>) -> (i32, i32) {
    %c0_i32 = arith.constant 0 : i32
    %c0_i32_0 = arith.constant 0 : i32
    return %arg0, %c0_i32 : i32, i32
  }
}

</mosaic_0001>

<bundles_post_ra>
// kernel: tpu_custom_call.1
= control target key start
LH: loop header
LB: loop body
LE: loop exit
PB: predicated region body
PF: predicated region fallthrough
CT: control target
= control target key end

     0   :  { %8 = vsyncpa [#allocation5], 0  ;;  %s295_s0 = inlined_call_operand.<no memory space> [shape: s32[1], index: 0, kind: input, shape index: {}]   ;;  %s296_s1 = inlined_call_operand.hbm [shape: s32[8,128], index: 1, kind: input, shape index: {}]   ;;  %s297_s2 = inlined_call_operand.hbm [shape: s32[8,128], index: 2, kind: output, shape index: {}]  }
   0x1   :  { %9 = vsyncpa [#allocation6], 0  ;;  %s237_s9 = smov [#allocation4]   ;;  %s189_s13 = scalar_lea.hbm %s296_s1, 128 }
   0x2   :  { %s16_s10 = sshll.u32 %s237_s9, 4  ;;  %p190_p0 = scmp.ne.s32.totalorder %s296_s1, %s189_s13  ;;  %s17_s10 = int_to_ptr.vmem [resolvable:$true] %s16_s10 }
   0x3   :  { %p193_p1 = scmp.lt.u32.totalorder %s189_s13, %s296_s1 }
   0x5   :  { %p195_p2 = pnand %p193_p1, %p190_p0 }
   0x7   :  { %198 = shalt.err (!%p195_p2)
}
   0x8   :  { %s199_s18 = scalar_lea.vmem %s17_s10, 128  ;;  %p204_p4 = scmp.lt.s32.totalorder %s17_s10, %s17_s10 }
   0x9   :  { %p200_p3 = scmp.ne.s32.totalorder %s17_s10, %s199_s18  ;;  %p205_p5 = scmp.lt.s32.totalorder %s199_s18, %s199_s18 }
   0xb   :  { %p206_p6 = por %p205_p5, %p204_p4 }
   0xd   :  { %p207_p7 = pnand %p206_p6, %p200_p3 }
   0xf   :  { %210 = shalt.err (!%p207_p7)
}
  0x10   :  { %19 = dma.hbm_to_vmem [thread:$0]  %s296_s1, 128, %s17_s10, [#allocation5]  }
  0x11   :  { %233 = dma.done.wait [#allocation5], 128  }
  0x12   :  { %234 = vsyncadd [#allocation5], 4294967168  ;;  %v23_v0 = vlaneseq  ;;  %v269_v4 = vstv %s295_s0  ;;  %s33_s24 = sxor.u32 2654435769, %s295_s0  ;;  %s238_s0 = smov [#allocation7]  }
  0x13   :  { %s34_s25 = sxor.u32 466688986, %s33_s24  ;;  %s172_s26 = sshll.u32 %s238_s0, 4  ;;  %s173_s26 = int_to_ptr.vmem [resolvable:$true] %s172_s26 }
  0x14   :  { %v24_v1 = vshrl.u32 %v23_v0, 7  ;;  %v26_v2 = vand.u32 127, %v23_v0  ;;  %v275_v23 = vstv %s34_s25  ;;  %s211_s27 = scalar_lea.vmem %s173_s26, 128  ;;  %p216_p9 = scmp.lt.s32.totalorder %s173_s26, %s173_s26 }
  0x15   :  { %p212_p8 = scmp.ne.s32.totalorder %s173_s26, %s211_s27  ;;  %p217_p10 = scmp.lt.s32.totalorder %s211_s27, %s211_s27 }
  0x16   :  { %v30_v3 = vshll.u32 %v24_v1, 7 }
  0x17   :  { %p218_p11 = por %p217_p10, %p216_p9 }
  0x18   :  { %v31_v5 = vor.u32 %v30_v3, %v26_v2 }
  0x19   :  { %p219_p12 = pnand %p218_p11, %p212_p8 }
  0x1a   :  { %v36_v6 = vadd.s32 %v269_v4, %v31_v5 }
  0x1c   :  { %v37_v7 = vadd.s32 2654435769, %v36_v6 }
  0x1e   :  { %v38_v8 = vxor.u32 4013372358, %v37_v7 }
  0x20   :  { %v39_v9 = vadd.s32 %v38_v8, %v37_v7  ;;  %v40_v10 = vshll.u32 %v38_v8, 15  ;;  %v41_v11 = vshrl.u32 %v38_v8, 17 }
  0x22   :  { %v42_v12 = vor.u32 %v41_v11, %v40_v10 }
  0x24   :  { %v43_v13 = vxor.u32 %v42_v12, %v39_v9 }
  0x26   :  { %v44_v14 = vadd.s32 %v43_v13, %v39_v9  ;;  %v45_v15 = vshll.u32 %v43_v13, 26  ;;  %v46_v16 = vshrl.u32 %v43_v13, 6 }
  0x28   :  { %v47_v17 = vor.u32 %v46_v16, %v45_v15 }
  0x2a   :  { %v48_v18 = vxor.u32 %v47_v17, %v44_v14 }
  0x2c   :  { %v49_v19 = vadd.s32 %v48_v18, %v44_v14  ;;  %v50_v20 = vshll.u32 %v48_v18, 6  ;;  %v51_v21 = vshrl.u32 %v48_v18, 26 }
  0x2e   :  { %v52_v22 = vor.u32 %v51_v21, %v50_v20  ;;  %v54_v25 = vadd.s32 2654435769, %v49_v19 }
  0x30   :  { %v53_v24 = vxor.u32 %v52_v22, %v49_v19 }
  0x32   :  { %v56_v26 = vadd.s32 %v275_v23, %v53_v24 }
  0x34   :  { %v57_v27 = vadd.s32 1, %v56_v26 }
  0x36   :  { %v58_v28 = vadd.s32 %v57_v27, %v54_v25  ;;  %v59_v29 = vshll.u32 %v57_v27, 17  ;;  %v60_v30 = vshrl.u32 %v57_v27, 15 }
  0x38   :  { %v61_v31 = vor.u32 %v60_v30, %v59_v29 }
  0x3a   :  { %v62_v32 = vxor.u32 %v61_v31, %v58_v28 }
  0x3c   :  { %v63_v33 = vadd.s32 %v62_v32, %v58_v28  ;;  %v64_v34 = vshll.u32 %v62_v32, 29  ;;  %v65_v35 = vshrl.u32 %v62_v32, 3 }
  0x3e   :  { %v66_v36 = vor.u32 %v65_v35, %v64_v34 }
  0x40   :  { %v67_v37 = vxor.u32 %v66_v36, %v63_v33 }
  0x42   :  { %v68_v38 = vadd.s32 %v67_v37, %v63_v33  ;;  %v69_v39 = vshll.u32 %v67_v37, 16  ;;  %v70_v40 = vshrl.u32 %v67_v37, 16 }
  0x44   :  { %v71_v41 = vor.u32 %v70_v40, %v69_v39 }
  0x46   :  { %v72_v42 = vxor.u32 %v71_v41, %v68_v38 }
  0x48   :  { %v73_v43 = vadd.s32 %v72_v42, %v68_v38  ;;  %v74_v44 = vshll.u32 %v72_v42, 24  ;;  %v75_v45 = vshrl.u32 %v72_v42, 8 }
  0x4a   :  { %v76_v46 = vor.u32 %v75_v45, %v74_v44  ;;  %v78_v48 = vadd.s32 %v73_v43, %v275_v23 }
  0x4c   :  { %v77_v47 = vxor.u32 %v76_v46, %v73_v43 }
  0x4e   :  { %v79_v49 = vadd.s32 %v77_v47, %v269_v4 }
  0x50   :  { %v80_v50 = vadd.s32 2, %v79_v49 }
  0x52   :  { %v81_v51 = vadd.s32 %v80_v50, %v78_v48  ;;  %v82_v52 = vshll.u32 %v80_v50, 13  ;;  %v83_v53 = vshrl.u32 %v80_v50, 19  ;;  %v148_v50 = vld [vmem:[#allocation4] sm:$0xff] }
  0x54   :  { %v84_v54 = vor.u32 %v83_v53, %v82_v52  ;;  %v149_v52 = vcvt.s32.f32 %v148_v50 }
  0x56   :  { %v85_v55 = vxor.u32 %v84_v54, %v81_v51 }
  0x58   :  { %v86_v56 = vadd.s32 %v85_v55, %v81_v51  ;;  %v87_v57 = vshll.u32 %v85_v55, 15  ;;  %v88_v58 = vshrl.u32 %v85_v55, 17  ;;  %v150_v55 = vmul.f32 0.02, %v149_v52 }
  0x5a   :  { %v89_v59 = vor.u32 %v88_v58, %v87_v57 }
  0x5c   :  { %v90_v60 = vxor.u32 %v89_v59, %v86_v56  ;;  %v151_v59 = vadd.f32 0.82, %v150_v55 }
  0x5e   :  { %v91_v61 = vadd.s32 %v90_v60, %v86_v56  ;;  %v92_v62 = vshll.u32 %v90_v60, 26  ;;  %v93_v63 = vshrl.u32 %v90_v60, 6 }
  0x60   :  { %v94_v0 = vor.u32 %v93_v63, %v92_v62 }
  0x62   :  { %v95_v1 = vxor.u32 %v94_v0, %v91_v61 }
  0x64   :  { %v96_v2 = vadd.s32 %v95_v1, %v91_v61  ;;  %v97_v3 = vshll.u32 %v95_v1, 6  ;;  %v98_v5 = vshrl.u32 %v95_v1, 26 }
  0x66   :  { %v99_v6 = vor.u32 %v98_v5, %v97_v3  ;;  %v101_v8 = vadd.s32 %v96_v2, %v269_v4 }
  0x68   :  { %v100_v7 = vxor.u32 %v99_v6, %v96_v2 }
  0x6a   :  { %v102_v9 = vadd.s32 2654435769, %v100_v7 }
  0x6c   :  { %v103_v10 = vadd.s32 3, %v102_v9 }
  0x6e   :  { %v104_v11 = vadd.s32 %v103_v10, %v101_v8  ;;  %v105_v12 = vshll.u32 %v103_v10, 17  ;;  %v106_v13 = vshrl.u32 %v103_v10, 15 }
  0x70   :  { %v107_v14 = vor.u32 %v106_v13, %v105_v12 }
  0x72   :  { %v108_v15 = vxor.u32 %v107_v14, %v104_v11 }
  0x74   :  { %v109_v16 = vadd.s32 %v108_v15, %v104_v11  ;;  %v110_v17 = vshll.u32 %v108_v15, 29  ;;  %v111_v18 = vshrl.u32 %v108_v15, 3 }
  0x76   :  { %v112_v19 = vor.u32 %v111_v18, %v110_v17 }
  0x78   :  { %v113_v20 = vxor.u32 %v112_v19, %v109_v16 }
  0x7a   :  { %v114_v21 = vadd.s32 %v113_v20, %v109_v16  ;;  %v115_v22 = vshll.u32 %v113_v20, 16  ;;  %v116_v24 = vshrl.u32 %v113_v20, 16 }
  0x7c   :  { %v117_v25 = vor.u32 %v116_v24, %v115_v22 }
  0x7e   :  { %v118_v26 = vxor.u32 %v117_v25, %v114_v21 }
  0x80   :  { %v119_v27 = vadd.s32 %v118_v26, %v114_v21  ;;  %v120_v28 = vshll.u32 %v118_v26, 24  ;;  %v121_v4 = vshrl.u32 %v118_v26, 8 }
  0x82   :  { %v122_v29 = vor.u32 %v121_v4, %v120_v28  ;;  %v124_v31 = vadd.s32 2654435769, %v119_v27 }
  0x84   :  { %v123_v30 = vxor.u32 %v122_v29, %v119_v27 }
  0x86   :  { %v125_v32 = vadd.s32 %v123_v30, %v275_v23 }
  0x88   :  { %v126_v33 = vadd.s32 4, %v125_v32 }
  0x8a   :  { %v127_v34 = vadd.s32 %v126_v33, %v124_v31  ;;  %v128_v35 = vshll.u32 %v126_v33, 13  ;;  %v129_v36 = vshrl.u32 %v126_v33, 19 }
  0x8c   :  { %v130_v37 = vor.u32 %v129_v36, %v128_v35 }
  0x8e   :  { %v131_v38 = vxor.u32 %v130_v37, %v127_v34 }
  0x90   :  { %v132_v39 = vadd.s32 %v131_v38, %v127_v34  ;;  %v133_v40 = vshll.u32 %v131_v38, 15  ;;  %v134_v41 = vshrl.u32 %v131_v38, 17 }
  0x92   :  { %v135_v42 = vor.u32 %v134_v41, %v133_v40 }
  0x94   :  { %v136_v43 = vxor.u32 %v135_v42, %v132_v39 }
  0x96   :  { %v137_v44 = vadd.s32 %v136_v43, %v132_v39  ;;  %v138_v45 = vshll.u32 %v136_v43, 26  ;;  %v139_v46 = vshrl.u32 %v136_v43, 6 }
  0x98   :  { %v140_v47 = vor.u32 %v139_v46, %v138_v45 }
  0x9a   :  { %v141_v48 = vxor.u32 %v140_v47, %v137_v44 }
  0x9c   :  { %v142_v49 = vadd.s32 %v141_v48, %v137_v44 }
  0x9e   :  { %v143_v51 = vadd.s32 %v142_v49, %v275_v23 }
  0xa0   :  { %v144_v53 = vshrl.u32 %v143_v51, 9 }
  0xa2   :  { %v145_v54 = vor.u32 1065353216, %v144_v53 }
  0xa4   :  { %v181_v56 = vadd.f32 -1.0, %v145_v54 }
  0xa6   :  { %v152_v57 = vmul.f32 50.0, %v181_v56  ;;  %v182_v58 = vadd.f32 -0.8, %v181_v56  ;;  %vm158_vm0 = vcmp.lt.f32.partialorder %v181_v56, %v151_v59  ;;  %vm157_vm1 = vcmp.lt.f32.partialorder %v181_v56, %v150_v55 }
  0xa8   :  { %v183_v60 = vtrunc.f32 %v152_v57  ;;  %v155_v61 = vmul.f32 50.0, %v182_v58 }
  0xaa   :  { %v185_v62 = vtrunc.f32 %v155_v61  ;;  %v184_v63 = vcvt.f32.s32 %v183_v60 }
  0xac   :  { %v186_v0 = vcvt.f32.s32 %v185_v62 }
  0xae   :  { %v159_v1 = vsel %vm158_vm0, %v148_v50, %v186_v0 }
  0xaf   :  { %v160_v2 = vsel %vm157_vm1, %v184_v63, %v159_v1 }
  0xb0   :  { %vm161_vm2 = vcmp.gt.s32.totalorder %v160_v2, 0 }
  0xb1   :  { %v162_v23 = vsel %vm161_vm2, %v160_v2, 0 }
  0xb2   :  { %vm163_vm3 = vcmp.lt.s32.totalorder %v162_v23, 9 }
  0xb3   :  { %v164_v3 = vsel %vm163_vm3, %v162_v23, 9 }
  0xb4   :  { %165 = vst [vmem:[#allocation7] sm:$0xff] %v164_v3 }
  0xb5   :  { %222 = shalt.err (!%p219_p12)
}
  0xb6   :  { %s223_s30 = scalar_lea.hbm %s297_s2, 128 }
  0xb7   :  { %p224_p13 = scmp.ne.s32.totalorder %s297_s2, %s223_s30  ;;  %p227_p0 = scmp.lt.u32.totalorder %s223_s30, %s297_s2 }
  0xb9   :  { %p229_p1 = pnand %p227_p0, %p224_p13 }
  0xbb   :  { %232 = shalt.err (!%p229_p1)
}
  0xbc   :  { %175 = dma.vmem_to_hbm [thread:$0]  %s173_s26, 128, %s297_s2, [#allocation6]  }
  0xbd   :  { %235 = dma.done.wait [#allocation6], 128  }
  0xbe   :  { %236 = vsyncadd [#allocation6], 4294967168 }
  0xbf   :  { %179 = vsyncpa [#allocation5], 1 }
  0xc0   :  { %180 = vsyncpa [#allocation6], 1 }

</bundles_post_ra>
